<compile_context>
chip_gen: v5e
topology: v5e:2x2
jax: 0.10.0
libtpu: 0.0.40
codegen_flags: <defaults>
</compile_context>

<pallas_src>
import functools

import jax
import jax.numpy as jnp
from jax.experimental import pallas as pl
from jax.experimental.pallas import tpu as pltpu


def _round_up(x, m):
    return (x + m - 1) // m * m


def _focal_loss_kernel(*refs, alpha, gamma, per_class_alpha):
    if per_class_alpha:
        logits_ref, targets_ref, alpha_ref, row_loss_ref = refs
    else:
        logits_ref, targets_ref, row_loss_ref = refs
        alpha_ref = None

    x = logits_ref[...].astype(jnp.float32)           # (TILE_N, C) f32 compute
    t = targets_ref[...]                              # (TILE_N, 1) int32 labels
    c = x.shape[-1]

    # --- numerically stable cross-entropy without materializing logp ---
    m = jnp.max(x, axis=-1, keepdims=True)            # (TILE_N, 1)
    z = x - m
    lse = jnp.log(jnp.sum(jnp.exp(z), axis=-1, keepdims=True))   # (TILE_N, 1)

    col = jax.lax.broadcasted_iota(jnp.int32, z.shape, 1)        # (TILE_N, C)
    onehot = col == t                                            # (TILE_N, C) bool
    z_t = jnp.sum(jnp.where(onehot, z, 0.0), axis=-1, keepdims=True)  # z[target]
    ce = jnp.maximum(lse - z_t, 0.0)                  # clamp kills rounding-negatives

    # --- focal modulation: (1 - p_t)^gamma ---
    p_t = jnp.exp(-ce)                                # (TILE_N, 1), <= 1
    d = jnp.maximum(1.0 - p_t, 0.0)
    if gamma == 2.0:                                  # module default: one VPU mul
        mod = d * d
    elif gamma == 1.0:
        mod = d
    elif gamma == 0.0:
        mod = jnp.ones_like(d)
    else:
        # general float gamma: pow via exp/log with a domain clamp (no NaN at d=0)
        mod = jnp.where(d > 0.0,
                        jnp.exp(gamma * jnp.log(jnp.maximum(d, 1e-30))),
                        0.0)

    # --- alpha weighting: scalar constant or per-class gather ---
    if per_class_alpha:
        a_row = alpha_ref[...].astype(jnp.float32)    # (1, C)
        alpha_t = jnp.sum(jnp.where(onehot, a_row, 0.0), axis=-1, keepdims=True)
    else:
        alpha_t = jnp.float32(alpha)

    # Padded / out-of-range labels contribute exactly 0 loss.
    valid = jnp.logical_and(t >= 0, t < c)            # (TILE_N, 1) bool
    row_loss_ref[...] = jnp.where(valid, alpha_t * mod * ce, 0.0)


def focal_loss(logits, targets, *, alpha=1.0, gamma=2.0, reduction="mean"):
    """Pallas FocalLoss forward. logits: (N, C) float, targets: (N,) int.

    `alpha` may be a python scalar (baked into the kernel) or a length-C
    vector (per-class weights, gathered per row inside the kernel).
    """
    n, c = logits.shape

    # --- alpha handling ---
    per_class_alpha = False
    alpha_vec = None
    if isinstance(alpha, (int, float)):
        alpha_scalar = float(alpha)
    else:
        a = jnp.asarray(alpha, dtype=jnp.float32)
        if a.size > 1:
            assert a.size == c, "per-class alpha must have length C"
            per_class_alpha = True
            alpha_vec = a.reshape(1, c)
            alpha_scalar = 1.0
        else:
            alpha_scalar = float(a.reshape(()))

    # --- choose a batch tile: multiple of 8 sublanes, bounded by ~4 MiB per
    #     logits buffer (2x double-buffered fits every generation's VMEM) ---
    bytes_per_elem = jnp.dtype(logits.dtype).itemsize
    max_tile_rows = max(8, ((4 * 1024 * 1024) // max(1, c * bytes_per_elem)) // 8 * 8)
    tile_n = min(1024, max_tile_rows, _round_up(n, 8))
    tile_n = max(8, (tile_n // 8) * 8)

    # --- pad batch to a tile multiple; padded labels = -1 -> zero contribution ---
    n_pad = _round_up(n, tile_n)
    num_tiles = n_pad // tile_n
    if n_pad != n:
        logits_p = jnp.pad(logits, ((0, n_pad - n), (0, 0)))
        targets_p = jnp.pad(targets.astype(jnp.int32), ((0, n_pad - n),),
                            constant_values=-1)
    else:
        logits_p = logits
        targets_p = targets.astype(jnp.int32)
    targets2d = targets_p.reshape(n_pad, 1)

    kernel = functools.partial(_focal_loss_kernel,
                               alpha=alpha_scalar, gamma=float(gamma),
                               per_class_alpha=per_class_alpha)

    in_specs = [
        pl.BlockSpec((tile_n, c), lambda i: (i, 0)),   # logits tile
        pl.BlockSpec((tile_n, 1), lambda i: (i, 0)),   # label tile
    ]
    call_args = [logits_p, targets2d]
    if per_class_alpha:
        in_specs.append(pl.BlockSpec((1, c), lambda i: (0, 0)))   # alpha row (resident)
        call_args.append(alpha_vec)

    cost = pl.CostEstimate(
        flops=6 * n_pad * c,
        transcendentals=n_pad * c + 2 * n_pad,
        bytes_accessed=n_pad * c * bytes_per_elem + n_pad * 4 + n_pad * 4,
    )

    row_losses = pl.pallas_call(
        kernel,
        out_shape=jax.ShapeDtypeStruct((n_pad, 1), jnp.float32),
        grid_spec=pltpu.PrefetchScalarGridSpec(
            num_scalar_prefetch=0,
            grid=(num_tiles,),
            in_specs=in_specs,
            out_specs=pl.BlockSpec((tile_n, 1), lambda i: (i, 0)),
        ),
        compiler_params=pltpu.CompilerParams(
            dimension_semantics=("parallel",),
        ),
        cost_estimate=cost,
    )(*call_args)

    if reduction == "mean":
        return jnp.sum(row_losses) / n
    elif reduction == "sum":
        return jnp.sum(row_losses)
    else:  # 'none'
        return row_losses[:n, 0]


def _focal_loss_ref(logits, targets, alpha=1.0, gamma=2.0, reduction="mean"):
    """Plain-JAX reference mirroring the PyTorch module."""
    logp = jax.nn.log_softmax(logits.astype(jnp.float32), axis=-1)
    ce = -jnp.take_along_axis(logp, targets[:, None].astype(jnp.int32), axis=-1)[:, 0]
    p_t = jnp.exp(-ce)
    a = jnp.asarray(alpha, dtype=jnp.float32)
    alpha_t = a[targets] if a.ndim >= 1 and a.size > 1 else a
    loss = alpha_t * (1.0 - p_t) ** gamma * ce
    if reduction == "mean":
        return jnp.mean(loss)
    elif reduction == "sum":
        return jnp.sum(loss)
    return loss


if __name__ == "__main__":
    key = jax.random.PRNGKey(0)
    k1, k2 = jax.random.split(key)

    N, C = 10, 16                      # small synthetic shapes (N not a tile multiple)
    logits = jax.random.normal(k1, (N, C), dtype=jnp.float32)
    targets = jax.random.randint(k2, (N,), 0, C, dtype=jnp.int32)

    # default path: mean reduction, gamma=2, scalar alpha
    out = jax.block_until_ready(focal_loss(logits, targets, alpha=1.0, gamma=2.0,
                                           reduction="mean"))
    ref = _focal_loss_ref(logits, targets, alpha=1.0, gamma=2.0, reduction="mean")
    assert jnp.allclose(out, ref, rtol=1e-5, atol=1e-5), (out, ref)

    # sum / none reductions
    out_sum = jax.block_until_ready(focal_loss(logits, targets, reduction="sum"))
    ref_sum = _focal_loss_ref(logits, targets, reduction="sum")
    assert jnp.allclose(out_sum, ref_sum, rtol=1e-5, atol=1e-5), (out_sum, ref_sum)

    out_none = jax.block_until_ready(focal_loss(logits, targets, reduction="none"))
    ref_none = _focal_loss_ref(logits, targets, reduction="none")
    assert jnp.allclose(out_none, ref_none, rtol=1e-5, atol=1e-5)

    # non-default gamma (general pow path)
    out_g = jax.block_until_ready(focal_loss(logits, targets, gamma=1.5))
    ref_g = _focal_loss_ref(logits, targets, gamma=1.5)
    assert jnp.allclose(out_g, ref_g, rtol=1e-5, atol=1e-5), (out_g, ref_g)

    # per-class alpha vector (the alpha[targets] branch of the module)
    alpha_vec = jnp.linspace(0.5, 1.5, C, dtype=jnp.float32)
    out_a = jax.block_until_ready(focal_loss(logits, targets, alpha=alpha_vec))
    ref_a = _focal_loss_ref(logits, targets, alpha=alpha_vec)
    assert jnp.allclose(out_a, ref_a, rtol=1e-5, atol=1e-5), (out_a, ref_a)

    print("KERNEL_OK")
</pallas_src>

<mosaic_0001>
module attributes {stable_mosaic.version = 11 : i64} {
  func.func @_focal_loss_kernel(%arg0: i32, %arg1: memref<16x16xf32, #tpu.memory_space<vmem>>, %arg2: memref<16x1xi32, #tpu.memory_space<vmem>>, %arg3: memref<16x1xf32, #tpu.memory_space<vmem>>) attributes {dimension_semantics = [#tpu.dimension_semantics<parallel>], iteration_bounds = array<i64: 1>, scalar_prefetch = 0 : i64, scratch_operands = 0 : i64, tpu.core_type = #tpu.core_type<tc>, window_params = [{transform_indices = @transform_0, window_bounds = array<i64: 16, 16>}, {transform_indices = @transform_1, window_bounds = array<i64: 16, 1>}, {transform_indices = @transform_2, window_bounds = array<i64: 16, 1>}]} {
    %c0 = arith.constant 0 : index
    %c0_0 = arith.constant 0 : index
    %0 = vector.load %arg1[%c0, %c0_0] : memref<16x16xf32, #tpu.memory_space<vmem>>, vector<16x16xf32>
    %c0_1 = arith.constant 0 : index
    %c0_2 = arith.constant 0 : index
    %1 = vector.load %arg2[%c0_1, %c0_2] : memref<16x1xi32, #tpu.memory_space<vmem>>, vector<16x1xi32>
    %cst = arith.constant dense<0xFF800000> : vector<16xf32>
    %2 = vector.multi_reduction <maximumf>, %0, %cst [1] : vector<16x16xf32> to vector<16xf32>
    %3 = vector.shape_cast %2 : vector<16xf32> to vector<16x1xf32>
    %4 = vector.broadcast %3 : vector<16x1xf32> to vector<16x16xf32>
    %5 = arith.subf %0, %4 : vector<16x16xf32>
    %6 = math.exp %5 : vector<16x16xf32>
    %cst_3 = arith.constant dense<0.000000e+00> : vector<16xf32>
    %7 = vector.multi_reduction <add>, %6, %cst_3 [1] : vector<16x16xf32> to vector<16xf32>
    %8 = vector.shape_cast %7 : vector<16xf32> to vector<16x1xf32>
    %9 = math.log %8 : vector<16x1xf32>
    %10 = tpu.iota {dimensions = array<i32: 1>} : vector<16x16xi32>
    %11 = vector.broadcast %1 : vector<16x1xi32> to vector<16x16xi32>
    %12 = arith.cmpi eq, %10, %11 : vector<16x16xi32>
    %cst_4 = arith.constant 0.000000e+00 : f32
    %13 = vector.broadcast %cst_4 : f32 to vector<16x16xf32>
    %14 = arith.select %12, %5, %13 : vector<16x16xi1>, vector<16x16xf32>
    %cst_5 = arith.constant dense<0.000000e+00> : vector<16xf32>
    %15 = vector.multi_reduction <add>, %14, %cst_5 [1] : vector<16x16xf32> to vector<16xf32>
    %16 = vector.shape_cast %15 : vector<16xf32> to vector<16x1xf32>
    %17 = arith.subf %9, %16 : vector<16x1xf32>
    %cst_6 = arith.constant 0.000000e+00 : f32
    %18 = vector.broadcast %cst_6 : f32 to vector<16x1xf32>
    %19 = arith.maximumf %17, %18 : vector<16x1xf32>
    %cst_7 = arith.constant 0.000000e+00 : f32
    %20 = vector.broadcast %cst_7 : f32 to vector<16x1xf32>
    %21 = arith.subf %20, %19 : vector<16x1xf32>
    %22 = math.exp %21 : vector<16x1xf32>
    %cst_8 = arith.constant 1.000000e+00 : f32
    %23 = vector.broadcast %cst_8 : f32 to vector<16x1xf32>
    %24 = arith.subf %23, %22 : vector<16x1xf32>
    %cst_9 = arith.constant 0.000000e+00 : f32
    %25 = vector.broadcast %cst_9 : f32 to vector<16x1xf32>
    %26 = arith.maximumf %24, %25 : vector<16x1xf32>
    %27 = arith.mulf %26, %26 : vector<16x1xf32>
    %c0_i32 = arith.constant 0 : i32
    %28 = vector.broadcast %c0_i32 : i32 to vector<16x1xi32>
    %29 = arith.cmpi sge, %1, %28 : vector<16x1xi32>
    %c16_i32 = arith.constant 16 : i32
    %30 = vector.broadcast %c16_i32 : i32 to vector<16x1xi32>
    %31 = arith.cmpi slt, %1, %30 : vector<16x1xi32>
    %32 = arith.andi %29, %31 : vector<16x1xi1>
    %cst_10 = arith.constant 1.000000e+00 : f32
    %33 = vector.broadcast %cst_10 : f32 to vector<16x1xf32>
    %34 = arith.mulf %33, %27 : vector<16x1xf32>
    %35 = arith.mulf %34, %19 : vector<16x1xf32>
    %cst_11 = arith.constant 0.000000e+00 : f32
    %36 = vector.broadcast %cst_11 : f32 to vector<16x1xf32>
    %37 = arith.select %32, %35, %36 : vector<16x1xi1>, vector<16x1xf32>
    %c0_12 = arith.constant 0 : index
    %c0_13 = arith.constant 0 : index
    %38 = vector.load %arg3[%c0_12, %c0_13] : memref<16x1xf32, #tpu.memory_space<vmem>>, vector<16x1xf32>
    tpu.vector_store %arg3[%c0_12, %c0_13], %37 {strides = array<i32>} : memref<16x1xf32, #tpu.memory_space<vmem>>, vector<16x1xf32>,
    return
  }
  func.func @transform_0(%arg0: i32) -> (i32, i32) {
    %c0_i32 = arith.constant 0 : i32
    %c0_i32_0 = arith.constant 0 : i32
    return %arg0, %c0_i32 : i32, i32
  }
  func.func @transform_1(%arg0: i32) -> (i32, i32) {
    %c0_i32 = arith.constant 0 : i32
    %c0_i32_0 = arith.constant 0 : i32
    return %arg0, %c0_i32 : i32, i32
  }
  func.func @transform_2(%arg0: i32) -> (i32, i32) {
    %c0_i32 = arith.constant 0 : i32
    %c0_i32_0 = arith.constant 0 : i32
    return %arg0, %c0_i32 : i32, i32
  }
}

</mosaic_0001>

<bundles_post_ra>
// kernel: tpu_custom_call.1
= control target key start
LH: loop header
LB: loop body
LE: loop exit
PB: predicated region body
PF: predicated region fallthrough
CT: control target
= control target key end

     0   :  { %vm15_vm0 = vcmask 130048   ;;  %v104_v1 = vmov 0   ;;  %v38_v7 = vlaneseq  ;;  %vm82_vm6 = vcmask 7168   ;;  %s149_s0 = inlined_call_operand.vmem [shape: f32[16,16], index: 0, kind: input, shape index: {}]   ;;  %s150_s1 = inlined_call_operand.vmem [shape: s32[16,1], index: 1, kind: input, shape index: {}]   ;;  %s151_s2 = inlined_call_operand.vmem [shape: f32[16,1], index: 2, kind: output, shape index: {}]  }
   0x1   :  { %v11_v0 = vld [vmem:[%s149_s0] sm:$0xff]  ;;  %90 = vset.pattern.permute.xlu1 %v104_v1  ;;  %91 = vset.pattern.permute.xlu0 %v104_v1  ;;  %v12_v4 = vld [vmem:[%s149_s0 + $0x8] sm:$0xff] }
   0x2   :  { %v13_v2 = vld [vmem:[%s150_s1] sm:$0xff]  ;;  %v16_v3 = vsel %vm15_vm0, %v11_v0, -inf  ;;  %v133_v5 = vld [vmem:[%s150_s1 + $0x8] sm:$0xff]  ;;  %v19_v6 = vsel %vm15_vm0, %v12_v4, -inf  ;;  %v39_v8 = vand.u32 127, %v38_v7 }
   0x3   :  { %41 = vperm.xlu1 %90, %v13_v2   ;;  %17 = vmax.xlane.f32.xlu0 %v16_v3  ;;  %vm72_vm3 = vcmp.ge.s32.totalorder %v13_v2, 0  ;;  %vm74_vm4 = vcmp.lt.s32.totalorder %v13_v2, 16  ;;  %vm73_vm7 = vcmp.ge.s32.totalorder %v133_v5, 0  ;;  %vm75_vm8 = vcmp.lt.s32.totalorder %v133_v5, 16 }
   0x4   :  { %vm76_vm5 = vmand %vm72_vm3, %vm74_vm4 }
   0x5   :  { %vm77_vm9 = vmand %vm73_vm7, %vm75_vm8 }
   0xb   :  { %44 = vperm.xlu1 %90, %v133_v5   ;;  %20 = vmax.xlane.f32.xlu0 %v19_v6 }
  0x75   :  { %v42_v9 = vpop.permute.xlu1 %41 }
  0x76   :  { %v18_v10 = vpop.xlane.xlu0 %17  ;;  %vm46_vm1 = vcmp.eq.s32.totalorder %v39_v8, %v42_v9 }
  0x77   :  { %v22_v11 = vsub.f32 %v11_v0, %v18_v10 }
  0x79   :  { %v24_v12 = vmul.f32 1.442695, %v22_v11  ;;  %v48_v13 = vsel %vm46_vm1, %v22_v11, 0.0 }
  0x7a   :  { %v50_v14 = vsel %vm15_vm0, %v48_v13, 0.0 }
  0x7b   :  { %92 = vpow2.f32 %v24_v12  ;;  %51 = vadd.xlane.f32.xlu0 %v50_v14 }
  0x7d   :  { %v45_v15 = vpop.permute.xlu1 %44 }
  0x7e   :  { %v21_v16 = vpop.xlane.xlu0 %20  ;;  %vm47_vm2 = vcmp.eq.s32.totalorder %v39_v8, %v45_v15 }
  0x7f   :  { %v23_v17 = vsub.f32 %v12_v4, %v21_v16 }
  0x81   :  { %v93_v18 = vpop.eup %92  ;;  %v26_v19 = vmul.f32 1.442695, %v23_v17  ;;  %v49_v20 = vsel %vm47_vm2, %v23_v17, 0.0 }
  0x82   :  { %v28_v21 = vsel %vm15_vm0, %v93_v18, 0.0  ;;  %v53_v22 = vsel %vm15_vm0, %v49_v20, 0.0 }
  0x83   :  { %94 = vpow2.f32 %v26_v19  ;;  %29 = vadd.xlane.f32.xlu2 %v28_v21  ;;  %54 = vadd.xlane.f32.xlu1 %v53_v22 }
  0x89   :  { %v95_v23 = vpop.eup %94 }
  0x8a   :  { %v31_v24 = vsel %vm15_vm0, %v95_v23, 0.0 }
  0x8b   :  { %32 = vadd.xlane.f32.xlu2 %v31_v24 }
  0xee   :  { %v52_v29 = vpop.xlane.xlu0 %51 }
  0xf6   :  { %v30_v25 = vpop.xlane.xlu2 %29  ;;  %v55_v36 = vpop.xlane.xlu1 %54 }
  0xf7   :  { %96 = vlog2.f32 %v30_v25 }
  0xfd   :  { %v97_v26 = vpop.eup %96 }
  0xfe   :  { %v35_v27 = vmul.f32 0.6931472, %v97_v26  ;;  %v33_v28 = vpop.xlane.xlu2 %32 }
  0xff   :  { %98 = vlog2.f32 %v33_v28 }
 0x100   :  { %v56_v30 = vsub.f32 %v35_v27, %v52_v29 }
 0x102   :  { %v58_v31 = vmax.f32 %v56_v30, 0.0 }
 0x104   :  { %v60_v32 = vsub.f32 0.0, %v58_v31 }
 0x105   :  { %v99_v33 = vpop.eup %98 }
 0x106   :  { %v62_v34 = vmul.f32 1.442695, %v60_v32  ;;  %v37_v35 = vmul.f32 0.6931472, %v99_v33 }
 0x108   :  { %100 = vpow2.f32 %v62_v34  ;;  %v57_v37 = vsub.f32 %v37_v35, %v55_v36 }
 0x10a   :  { %v59_v38 = vmax.f32 %v57_v37, 0.0 }
 0x10c   :  { %v61_v39 = vsub.f32 0.0, %v59_v38 }
 0x10e   :  { %v101_v40 = vpop.eup %100  ;;  %v64_v41 = vmul.f32 1.442695, %v61_v39 }
 0x10f   :  { %v66_v42 = vsub.f32 1.0, %v101_v40 }
 0x110   :  { %102 = vpow2.f32 %v64_v41 }
 0x111   :  { %v68_v43 = vmax.f32 %v66_v42, 0.0 }
 0x113   :  { %v70_v44 = vmul.f32 %v68_v43, %v68_v43 }
 0x115   :  { %v78_v45 = vmul.f32 %v70_v44, %v58_v31 }
 0x116   :  { %v103_v46 = vpop.eup %102 }
 0x117   :  { %v80_v47 = vsel %vm76_vm5, %v78_v45, 0.0  ;;  %v67_v48 = vsub.f32 1.0, %v103_v46 }
 0x118   :  { %83 = vst.msk [vmem:[%s151_s2] sm:$0xff] %vm82_vm6, %v80_v47 }
 0x119   :  { %v69_v49 = vmax.f32 %v67_v48, 0.0 }
 0x11b   :  { %v71_v50 = vmul.f32 %v69_v49, %v69_v49 }
 0x11d   :  { %v79_v51 = vmul.f32 %v71_v50, %v59_v38 }
 0x11f   :  { %v81_v52 = vsel %vm77_vm9, %v79_v51, 0.0 }
 0x120   :  { %84 = vst.msk [vmem:[%s151_s2 + $0x8] sm:$0xff] %vm82_vm6, %v81_v52 }

</bundles_post_ra>
